<compile_context>
chip_gen: v7x
topology: tpu7x:2x2x1
jax: 0.10.0
libtpu: 0.0.40
codegen_flags: <defaults>
</compile_context>

<pallas_src>
import functools

import jax
import jax.numpy as jnp
from jax.experimental import pallas as pl
from jax.experimental.pallas import tpu as pltpu


def mlp3_kernel(x_ref, w1_ref, b1_ref, w2_ref, b2_ref, w3_ref, b3_ref, o_ref):
    """fc1 -> relu -> fc2 -> relu -> fc3, fused, f32 compute / f32 accumulate."""
    x = x_ref[...].astype(jnp.float32)            # (bb, in_dim)
    w1 = w1_ref[...].astype(jnp.float32)          # (in_dim, h1)
    in_dim = x_ref.shape[1]

    # ---- Layer 1: K = in_dim (tiny) -> VPU broadcast-FMAs, skip the MXU. ----
    acc = x[:, 0:1] * w1[0:1, :]
    for k in range(1, in_dim):                    # static, fully unrolled
        acc = acc + x[:, k:k + 1] * w1[k:k + 1, :]
    h1 = jnp.maximum(acc + b1_ref[...].astype(jnp.float32), 0.0)

    # ---- Layers 2 & 3: MXU matmuls with f32 accumulation. ----
    h2 = jnp.dot(h1, w2_ref[...].astype(jnp.float32),
                 preferred_element_type=jnp.float32)
    h2 = jnp.maximum(h2 + b2_ref[...].astype(jnp.float32), 0.0)
    h3 = jnp.dot(h2, w3_ref[...].astype(jnp.float32),
                 preferred_element_type=jnp.float32)
    o_ref[...] = (h3 + b3_ref[...].astype(jnp.float32)).astype(o_ref.dtype)


def _pick_block_b(B):
    # Few, large grid steps: per-step overhead (~600 cycles) dominates at these
    # tiny layer widths.  Aim for 2 steps, each a multiple of 256 rows, capped
    # so double-buffered x/out tiles stay far below scoped-VMEM defaults on
    # every generation (v5e 16 MiB, v7x 32 MiB).
    MAX_BLOCK_B = 4096
    if B <= 256:
        return B                                   # one step; block == full dim
    half = -(-B // 2)
    block_b = -(-half // 256) * 256                # round up to multiple of 256
    return min(block_b, MAX_BLOCK_B)


@functools.partial(jax.jit, static_argnames=("out_dtype",))
def mlp3_pallas(x, w1, b1, w2, b2, w3, b3, *, out_dtype=None):
    B, in_dim = x.shape
    h1_dim = w1.shape[1]
    h2_dim = w2.shape[1]
    out_dim = w3.shape[1]
    out_dtype = jnp.dtype(x.dtype if out_dtype is None else out_dtype)

    block_b = _pick_block_b(B)
    nblocks = pl.cdiv(B, block_b)   # ragged last block handled by Pallas masking

    def rep2(i):
        # Weights/biases: same block every step -> Pallas skips re-DMA.
        return (0, 0)

    # Advisory cost hint for XLA's scheduler.
    flops = 2 * B * (in_dim * h1_dim + h1_dim * h2_dim + h2_dim * out_dim)
    bytes_accessed = (
        x.size * x.dtype.itemsize
        + (w1.size + w2.size + w3.size) * w1.dtype.itemsize
        + (b1.size + b2.size + b3.size) * b1.dtype.itemsize
        + B * out_dim * out_dtype.itemsize
    )
    cost = pl.CostEstimate(flops=flops, transcendentals=0,
                           bytes_accessed=bytes_accessed)

    return pl.pallas_call(
        mlp3_kernel,
        out_shape=jax.ShapeDtypeStruct((B, out_dim), out_dtype),
        grid_spec=pltpu.PrefetchScalarGridSpec(
            num_scalar_prefetch=0,
            grid=(nblocks,),
            in_specs=[
                pl.BlockSpec((block_b, in_dim), lambda i: (i, 0)),  # x tile
                pl.BlockSpec(w1.shape, rep2),
                pl.BlockSpec(b1.shape, rep2),
                pl.BlockSpec(w2.shape, rep2),
                pl.BlockSpec(b2.shape, rep2),
                pl.BlockSpec(w3.shape, rep2),
                pl.BlockSpec(b3.shape, rep2),
            ],
            out_specs=pl.BlockSpec((block_b, out_dim), lambda i: (i, 0)),
        ),
        compiler_params=pltpu.CompilerParams(
            dimension_semantics=("parallel",),
        ),
        cost_estimate=cost,
    )(x, w1, b1, w2, b2, w3, b3)


def init_linear_params(key, fan_in, fan_out, dtype=jnp.float32):
    # Deterministic PyTorch-style init: U(-1/sqrt(fan_in), 1/sqrt(fan_in)).
    kw, kb = jax.random.split(key)
    bound = 1.0 / jnp.sqrt(fan_in)
    w = jax.random.uniform(kw, (fan_in, fan_out), dtype, -bound, bound)
    b = jax.random.uniform(kb, (1, fan_out), dtype, -bound, bound)
    return w, b


def mlp3_reference(x, w1, b1, w2, b2, w3, b3):
    h1 = jnp.maximum(x @ w1 + b1, 0.0)
    h2 = jnp.maximum(h1 @ w2 + b2, 0.0)
    return h2 @ w3 + b3


if __name__ == "__main__":
    in_dim, out_dim = 3, 128
    B = 512   # -> block_b = 256, 2 grid steps (keeps both v7x TensorCores busy)

    key = jax.random.PRNGKey(0)
    kx, k1, k2, k3 = jax.random.split(key, 4)

    x = jax.random.normal(kx, (B, in_dim), jnp.float32)
    w1, b1 = init_linear_params(k1, in_dim, 16)
    w2, b2 = init_linear_params(k2, 16, 64)
    w3, b3 = init_linear_params(k3, 64, out_dim)

    ref = mlp3_reference(x, w1, b1, w2, b2, w3, b3)

    # Default path: f32 in, f32 compute, f32 out -> must match the reference.
    out = jax.block_until_ready(mlp3_pallas(x, w1, b1, w2, b2, w3, b3))
    assert out.shape == (B, out_dim)
    assert jnp.allclose(out, ref, atol=1e-5, rtol=1e-5), "f32 mismatch"

    # Narrow-writeback path: the [B,128] output dominates HBM traffic, so a
    # bf16 store roughly halves it when the consumer accepts bf16.
    out_bf16 = jax.block_until_ready(
        mlp3_pallas(x, w1, b1, w2, b2, w3, b3, out_dtype=jnp.bfloat16))
    assert out_bf16.dtype == jnp.bfloat16
    assert jnp.allclose(out_bf16.astype(jnp.float32), ref,
                        atol=5e-2, rtol=5e-2), "bf16-out mismatch"

    print("KERNEL_OK")
</pallas_src>

<mosaic_0001>
module attributes {stable_mosaic.version = 11 : i64} {
  func.func @mlp3_kernel(%arg0: i32, %arg1: memref<256x3xf32, #tpu.memory_space<vmem>>, %arg2: memref<3x16xf32, #tpu.memory_space<vmem>>, %arg3: memref<1x16xf32, #tpu.memory_space<vmem>>, %arg4: memref<16x64xf32, #tpu.memory_space<vmem>>, %arg5: memref<1x64xf32, #tpu.memory_space<vmem>>, %arg6: memref<64x128xf32, #tpu.memory_space<vmem>>, %arg7: memref<1x128xf32, #tpu.memory_space<vmem>>, %arg8: memref<256x128xf32, #tpu.memory_space<vmem>>) attributes {dimension_semantics = [#tpu.dimension_semantics<parallel>], iteration_bounds = array<i64: 2>, scalar_prefetch = 0 : i64, scratch_operands = 0 : i64, tpu.core_type = #tpu.core_type<tc>, window_params = [{transform_indices = @transform_0, window_bounds = array<i64: 256, 3>}, {pipeline_mode = #tpu.pipeline_mode<synchronous>, transform_indices = @transform_1, window_bounds = array<i64: 3, 16>}, {pipeline_mode = #tpu.pipeline_mode<synchronous>, transform_indices = @transform_2, window_bounds = array<i64: 1, 16>}, {pipeline_mode = #tpu.pipeline_mode<synchronous>, transform_indices = @transform_3, window_bounds = array<i64: 16, 64>}, {pipeline_mode = #tpu.pipeline_mode<synchronous>, transform_indices = @transform_4, window_bounds = array<i64: 1, 64>}, {pipeline_mode = #tpu.pipeline_mode<synchronous>, transform_indices = @transform_5, window_bounds = array<i64: 64, 128>}, {pipeline_mode = #tpu.pipeline_mode<synchronous>, transform_indices = @transform_6, window_bounds = array<i64: 1, 128>}, {transform_indices = @transform_7, window_bounds = array<i64: 256, 128>}]} {
    %c0 = arith.constant 0 : index
    %c0_0 = arith.constant 0 : index
    %0 = vector.load %arg1[%c0, %c0_0] : memref<256x3xf32, #tpu.memory_space<vmem>>, vector<256x3xf32>
    %c0_1 = arith.constant 0 : index
    %c0_2 = arith.constant 0 : index
    %1 = vector.load %arg2[%c0_1, %c0_2] : memref<3x16xf32, #tpu.memory_space<vmem>>, vector<3x16xf32>
    %2 = vector.extract_strided_slice %0 {offsets = [0, 0], sizes = [256, 1], strides = [1, 1]} : vector<256x3xf32> to vector<256x1xf32>
    %3 = vector.extract_strided_slice %1 {offsets = [0, 0], sizes = [1, 16], strides = [1, 1]} : vector<3x16xf32> to vector<1x16xf32>
    %4 = vector.broadcast %2 : vector<256x1xf32> to vector<256x16xf32>
    %5 = vector.broadcast %3 : vector<1x16xf32> to vector<256x16xf32>
    %6 = arith.mulf %4, %5 : vector<256x16xf32>
    %7 = vector.extract_strided_slice %0 {offsets = [0, 1], sizes = [256, 1], strides = [1, 1]} : vector<256x3xf32> to vector<256x1xf32>
    %8 = vector.extract_strided_slice %1 {offsets = [1, 0], sizes = [1, 16], strides = [1, 1]} : vector<3x16xf32> to vector<1x16xf32>
    %9 = vector.broadcast %7 : vector<256x1xf32> to vector<256x16xf32>
    %10 = vector.broadcast %8 : vector<1x16xf32> to vector<256x16xf32>
    %11 = arith.mulf %9, %10 : vector<256x16xf32>
    %12 = arith.addf %6, %11 : vector<256x16xf32>
    %13 = vector.extract_strided_slice %0 {offsets = [0, 2], sizes = [256, 1], strides = [1, 1]} : vector<256x3xf32> to vector<256x1xf32>
    %14 = vector.extract_strided_slice %1 {offsets = [2, 0], sizes = [1, 16], strides = [1, 1]} : vector<3x16xf32> to vector<1x16xf32>
    %15 = vector.broadcast %13 : vector<256x1xf32> to vector<256x16xf32>
    %16 = vector.broadcast %14 : vector<1x16xf32> to vector<256x16xf32>
    %17 = arith.mulf %15, %16 : vector<256x16xf32>
    %18 = arith.addf %12, %17 : vector<256x16xf32>
    %c0_3 = arith.constant 0 : index
    %c0_4 = arith.constant 0 : index
    %19 = vector.load %arg3[%c0_3, %c0_4] : memref<1x16xf32, #tpu.memory_space<vmem>>, vector<1x16xf32>
    %20 = vector.broadcast %19 : vector<1x16xf32> to vector<256x16xf32>
    %21 = arith.addf %18, %20 : vector<256x16xf32>
    %cst = arith.constant 0.000000e+00 : f32
    %22 = vector.broadcast %cst : f32 to vector<256x16xf32>
    %23 = arith.maximumf %21, %22 : vector<256x16xf32>
    %c0_5 = arith.constant 0 : index
    %c0_6 = arith.constant 0 : index
    %24 = vector.load %arg4[%c0_5, %c0_6] : memref<16x64xf32, #tpu.memory_space<vmem>>, vector<16x64xf32>
    %cst_7 = arith.constant dense<0.000000e+00> : vector<256x64xf32>
    %25 = tpu.matmul %23, %24, %cst_7 {dimension_numbers = #tpu.dot_dimension_numbers<[1], [0], [0], [1], [0, 0, 1, 1], [], []>} : vector<256x16xf32>, vector<16x64xf32>, vector<256x64xf32> -> vector<256x64xf32>
    %c0_8 = arith.constant 0 : index
    %c0_9 = arith.constant 0 : index
    %26 = vector.load %arg5[%c0_8, %c0_9] : memref<1x64xf32, #tpu.memory_space<vmem>>, vector<1x64xf32>
    %27 = vector.broadcast %26 : vector<1x64xf32> to vector<256x64xf32>
    %28 = arith.addf %25, %27 : vector<256x64xf32>
    %cst_10 = arith.constant 0.000000e+00 : f32
    %29 = vector.broadcast %cst_10 : f32 to vector<256x64xf32>
    %30 = arith.maximumf %28, %29 : vector<256x64xf32>
    %c0_11 = arith.constant 0 : index
    %c0_12 = arith.constant 0 : index
    %31 = vector.load %arg6[%c0_11, %c0_12] : memref<64x128xf32, #tpu.memory_space<vmem>>, vector<64x128xf32>
    %cst_13 = arith.constant dense<0.000000e+00> : vector<256x128xf32>
    %32 = tpu.matmul %30, %31, %cst_13 {dimension_numbers = #tpu.dot_dimension_numbers<[1], [0], [0], [1], [0, 0, 1, 1], [], []>} : vector<256x64xf32>, vector<64x128xf32>, vector<256x128xf32> -> vector<256x128xf32>
    %c0_14 = arith.constant 0 : index
    %c0_15 = arith.constant 0 : index
    %33 = vector.load %arg7[%c0_14, %c0_15] : memref<1x128xf32, #tpu.memory_space<vmem>>, vector<1x128xf32>
    %34 = vector.broadcast %33 : vector<1x128xf32> to vector<256x128xf32>
    %35 = arith.addf %32, %34 : vector<256x128xf32>
    %c0_16 = arith.constant 0 : index
    %c0_17 = arith.constant 0 : index
    %36 = vector.load %arg8[%c0_16, %c0_17] : memref<256x128xf32, #tpu.memory_space<vmem>>, vector<256x128xf32>
    tpu.vector_store %arg8[%c0_16, %c0_17], %35 {strides = array<i32>} : memref<256x128xf32, #tpu.memory_space<vmem>>, vector<256x128xf32>,
    return
  }
  func.func @transform_0(%arg0: i32) -> (i32, i32) {
    %c0_i32 = arith.constant 0 : i32
    %c0_i32_0 = arith.constant 0 : i32
    return %arg0, %c0_i32 : i32, i32
  }
  func.func @transform_1(%arg0: i32) -> (i32, i32) {
    %c0_i32 = arith.constant 0 : i32
    %c0_i32_0 = arith.constant 0 : i32
    %c0_i32_1 = arith.constant 0 : i32
    return %c0_i32, %c0_i32_0 : i32, i32
  }
  func.func @transform_2(%arg0: i32) -> (i32, i32) {
    %c0_i32 = arith.constant 0 : i32
    %c0_i32_0 = arith.constant 0 : i32
    %c0_i32_1 = arith.constant 0 : i32
    return %c0_i32, %c0_i32_0 : i32, i32
  }
  func.func @transform_3(%arg0: i32) -> (i32, i32) {
    %c0_i32 = arith.constant 0 : i32
    %c0_i32_0 = arith.constant 0 : i32
    %c0_i32_1 = arith.constant 0 : i32
    return %c0_i32, %c0_i32_0 : i32, i32
  }
  func.func @transform_4(%arg0: i32) -> (i32, i32) {
    %c0_i32 = arith.constant 0 : i32
    %c0_i32_0 = arith.constant 0 : i32
    %c0_i32_1 = arith.constant 0 : i32
    return %c0_i32, %c0_i32_0 : i32, i32
  }
  func.func @transform_5(%arg0: i32) -> (i32, i32) {
    %c0_i32 = arith.constant 0 : i32
    %c0_i32_0 = arith.constant 0 : i32
    %c0_i32_1 = arith.constant 0 : i32
    return %c0_i32, %c0_i32_0 : i32, i32
  }
  func.func @transform_6(%arg0: i32) -> (i32, i32) {
    %c0_i32 = arith.constant 0 : i32
    %c0_i32_0 = arith.constant 0 : i32
    %c0_i32_1 = arith.constant 0 : i32
    return %c0_i32, %c0_i32_0 : i32, i32
  }
  func.func @transform_7(%arg0: i32) -> (i32, i32) {
    %c0_i32 = arith.constant 0 : i32
    %c0_i32_0 = arith.constant 0 : i32
    return %arg0, %c0_i32 : i32, i32
  }
}

</mosaic_0001>

<bundles_post_ra>
// kernel: mlp3_pallas.1
= control target key start
LH: loop header
LB: loop body
LE: loop exit
PB: predicated region body
PF: predicated region fallthrough
CT: control target
= control target key end

     0   :  { %12 = vsyncpa [#allocation3], 0  ;;  %s2942_s0 = inlined_call_operand.vmem [shape: f32[512,3], index: 0, kind: input, shape index: {}]   ;;  %s2943_s1 = inlined_call_operand.vmem [shape: f32[3,16], index: 1, kind: input, shape index: {}]   ;;  %s2944_s2 = inlined_call_operand.vmem [shape: f32[1,16], index: 2, kind: input, shape index: {}]   ;;  %s2945_s3 = inlined_call_operand.vmem [shape: f32[16,64], index: 3, kind: input, shape index: {}]   ;;  %s2946_s4 = inlined_call_operand.vmem [shape: f32[1,64], index: 4, kind: input, shape index: {}]   ;;  %s2947_s5 = inlined_call_operand.vmem [shape: f32[64,128], index: 5, kind: input, shape index: {}]   ;;  %s2948_s6 = inlined_call_operand.vmem [shape: f32[1,128], index: 6, kind: input, shape index: {}]   ;;  %s2949_s7 = inlined_call_operand.hbm [shape: f32[512,128], index: 7, kind: output, shape index: {}]  }
   0x1   :  { %14 = vsyncpa [#allocation3 + $0x1], 0  ;;  %s2284_s24 = smov 0   ;;  %s2286_s25 = smov 0  }
   0x2   :  { %s2288_s26 = smov 0   ;;  %s2290_s27 = smov 0  }
   0x3 LB: > { %s2305_s28 = sadd.s32 4294967295, %s2236_s27   ;;  %s1780_s29 = sadd.s32 4294967294, %s2236_s27   ;;  %s2236_s27 = sphi %s2290_s27, %s2955_s27   ;;  %s2232_s26 = sphi %s2288_s26, %s2954_s26   ;;  %s2228_s25 = sphi %s2286_s25, %s2953_s25   ;;  %s2224_s24 = sphi %s2284_s24, %s2952_s24  }
   0x4   : > { %s2309_s30 = sadd.s32 1, %s2236_s27   ;;  %s179_s8 = sadd.s32 1, %s2232_s26 }
   0x5   : > { %s176_s9 = ssub.s32 %s2236_s27, %s2309_s30  ;;  %p189_p0 = scmp.ne.s32.totalorder %s2232_s26, %s2228_s25 }
   0x6   : > { %p177_p1 = scmp.eq.s32.totalorder %s176_s9, 0  ;;  %p190_p2 = scmp.eq.s32.totalorder %s2305_s28, 1 }
   0x7   : > { %p195_p3 = scmp.ne.s32.totalorder %s2228_s25, %s2224_s24  ;;  %p196_p4 = scmp.eq.s32.totalorder %s1780_s29, 1 }
   0x8   : > { %s2320_s10 = scalar_select %p177_p1, %s2232_s26, %s179_s8  }
   0x9   : > { %p2322_p5 = por %p190_p2, %p189_p0  ;;  %p2326_p6 = por %p196_p4, %p195_p3 }
   0xa   : > { %p1783_p7 = scmp.ge.s32.totalorder %s2236_s27, 1  ;;  %p241_p8 = scmp.lt.s32.totalorder %s2236_s27, 3 }
   0xc   : > { %p242_p9 = pnand %p1783_p7, %p241_p8 }
   0xd   : > { %s1785_s13 = sshll.u32 (!%p242_p9), %s2305_s28, 5  ;;  %v2238_v0 = vmov (!%p242_p9), 0   ;;  %v2239_v3 = vmov (!%p242_p9), 1   ;;  %v2240_v5 = vmov (!%p242_p9), 2   ;;  %v972_v24 = vld [vmem:[%s2945_s3] sm:$0xff] (!%p242_p9)  ;;  %v973_v25 = vld [vmem:[%s2945_s3 + $0x8] sm:$0xff] (!%p242_p9)  ;;  %v473_v29 = vlaneseq (!%p242_p9) }
   0xe   : > { %245 = sbr.rel (%p242_p9) target bundleno = 905 (0x389), region = 48  ;;  %2124 = vset.pattern.permute.xlu1 (!%p242_p9), %v2238_v0  ;;  %2122 = vset.pattern.permute.xlu0 (!%p242_p9), %v2238_v0  ;;  %p274_p10 = scmp.lt.s32.totalorder (!%p242_p9), %s1785_s13, 63  ;;  %v2050_v26 = vpack.c.bf16 (!%p242_p9), %v973_v25, %v972_v24  ;;  %v312_v33 = vld [vmem:[%s2943_s1] sm:$0x7] (!%p242_p9)  ;;  %vm981_vm0 = vcmask (!%p242_p9), 130048   ;;  %vm1350_vm1 = vcmask (!%p242_p9), 523264  }
   0xf   : > { %v474_v30 = vshrl.u32 (!%p242_p9), %v473_v29, 7  ;;  %v2478_v49 = vld [vmem:[%s2944_s2] ss:$0 sm:$0xff] (!%p242_p9)  ;;  %s270_s16 = sand.u32 (!%p242_p9), 1, %s2228_s25   ;;  %s1859_s21 = sshll.u32 (!%p242_p9), %s2305_s28, 12 }
  0x10   : > { %2051 = vmatprep.subr.bf16.mxu0 (!%p242_p9), %v2050_v26  ;;  %s2892_s8 = scalar_lea.hbm (!%p242_p9), %s2949_s7, %s1859_s21  ;;  %s2901_s28 = scalar_lea.sflag (!%p242_p9), [#allocation3], %s270_s16 }
  0x11   : > { %2053 = vmatpush3.bf16.msra.mxu0 (!%p242_p9), %v2050_v26  ;;  %v475_v31 = vsub.s32 (!%p242_p9), 0, %v474_v30  ;;  %v639_v36 = vsub.s32 (!%p242_p9), 1, %v474_v30  ;;  %v835_v38 = vsub.s32 (!%p242_p9), 2, %v474_v30 }
  0x13   : > { %v2459_v37 = vrot.slane (!%p242_p9), %v312_v33, %v475_v31  ;;  %v2461_v39 = vrot.slane (!%p242_p9), %v312_v33, %v639_v36  ;;  %v2469_v44 = vrot.slane (!%p242_p9), %v312_v33, %v835_v38 }
  0x15   : > { %s2957_s13 = smov (!%p274_p10, %s1785_s13), 63 }
  0x16   : > { %s1786_s14 = sshll.u32 %s2957_s13, 3  ;;  %s2241_s13 = smov [#allocation2]  }
  0x17   : > { %s2338_s17 = scalar_lea.vmem %s2942_s0, %s1786_s14  ;;  %s2178_s14 = sshll.u32 %s2241_s13, 4  ;;  %s2179_s14 = int_to_ptr.vmem [resolvable:$false] %s2178_s14 }
  0x18   : > { %v2341_v1 = vld [vmem:[%s2338_s17 + $0x8] sm:$0xff]  ;;  %v280_v2 = vld [vmem:[%s2338_s17] sm:$0xff]  ;;  %v2349_v4 = vld [vmem:[%s2338_s17 + $0x18] sm:$0xff]  ;;  %s2180_s15 = scalar_lea.vmem %s2179_s14, 8192 }
  0x19   : > { %320 = vperm.xlu1 %2124, %v2341_v1   ;;  %315 = vperm.xlu0 %2122, %v280_v2   ;;  %v2355_v6 = vld [vmem:[%s2338_s17 + $0x28] sm:$0xff]  ;;  %v282_v7 = vld [vmem:[%s2338_s17 + $0x10] sm:$0xff]  ;;  %v287_v8 = vld [vmem:[%s2338_s17 + $0x38] sm:$0xff] }
  0x1a   : > { %v289_v9 = vld [vmem:[%s2338_s17 + $0x48] sm:$0xff]  ;;  %v2364_v10 = vld [vmem:[%s2338_s17 + $0x58] sm:$0xff]  ;;  %v284_v12 = vld [vmem:[%s2338_s17 + $0x20] sm:$0xff] }
  0x1b   : > { %v2369_v11 = vld [vmem:[%s2338_s17 + $0x68] sm:$0xff]  ;;  %v2375_v13 = vld [vmem:[%s2338_s17 + $0x78] sm:$0xff]  ;;  %v286_v18 = vld [vmem:[%s2338_s17 + $0x30] sm:$0xff] }
  0x1c   : > { %v2380_v14 = vld [vmem:[%s2338_s17 + $0x88] sm:$0xff]  ;;  %v2385_v15 = vld [vmem:[%s2338_s17 + $0x98] sm:$0xff]  ;;  %v288_v23 = vld [vmem:[%s2338_s17 + $0x40] sm:$0xff] }
  0x1d   : > { %2125 = vset.pattern.permute.xlu1 %v2239_v3  ;;  %2123 = vset.pattern.permute.xlu0 %v2239_v3  ;;  %v2390_v16 = vld [vmem:[%s2338_s17 + $0xa8] sm:$0xff]  ;;  %v2395_v17 = vld [vmem:[%s2338_s17 + $0xb8] sm:$0xff]  ;;  %v290_v27 = vld [vmem:[%s2338_s17 + $0x50] sm:$0xff] }
  0x1e   : > { %514 = vperm.xlu1 %2125, %v2341_v1   ;;  %510 = vperm.xlu0 %2123, %v280_v2   ;;  %v2400_v19 = vld [vmem:[%s2338_s17 + $0xc8] sm:$0xff]  ;;  %v2405_v20 = vld [vmem:[%s2338_s17 + $0xd8] sm:$0xff]  ;;  %v292_v28 = vld [vmem:[%s2338_s17 + $0x60] sm:$0xff] }
  0x1f   : > { %v2410_v21 = vld [vmem:[%s2338_s17 + $0xe8] sm:$0xff]  ;;  %v2414_v22 = vld [vmem:[%s2338_s17 + $0xf8] sm:$0xff]  ;;  %v294_v32 = vld [vmem:[%s2338_s17 + $0x70] sm:$0xff] }
  0x20   : > { %v296_v56 = vld [vmem:[%s2338_s17 + $0x80] sm:$0xff] }
  0x22   : > { %2126 = vset.pattern.permute.xlu1 %v2240_v5  ;;  %2129 = vset.pattern.permute.xlu0 %v2238_v0 }
  0x23   : > { %706 = vperm.xlu1 %2126, %v280_v2   ;;  %330 = vperm.xlu0 %2129, %v2349_v4   ;;  %v298_v2 = vld [vmem:[%s2338_s17 + $0x90] sm:$0xff] }
  0x27   : > { %2127 = vset.pattern.permute.xlu1 %v2238_v0  ;;  %340 = vperm.xlu0 %2129, %v2355_v6  }
  0x28   : > { %325 = vperm.xlu1 %2127, %v282_v7  }
  0x2b   : > { %350 = vperm.xlu0 %2129, %v287_v8  }
  0x2c   : > { %2128 = vset.pattern.permute.xlu1 %v2239_v3 }
  0x2d   : > { %518 = vperm.xlu1 %2128, %v282_v7  }
  0x2f   : > { %360 = vperm.xlu0 %2129, %v289_v9  }
  0x31   : > { %522 = vperm.xlu1 %2128, %v2349_v4  }
  0x33   : > { %370 = vperm.xlu0 %2129, %v2364_v10  }
  0x35   : > { %2130 = vset.pattern.permute.xlu1 %v2240_v5 }
  0x36   : > { %714 = vperm.xlu1 %2130, %v282_v7  }
  0x37   : > { %380 = vperm.xlu0 %2129, %v2369_v11  }
  0x3a   : > { %2131 = vset.pattern.permute.xlu1 %v2238_v0 }
  0x3b   : > { %335 = vperm.xlu1 %2131, %v284_v12   ;;  %390 = vperm.xlu0 %2129, %v2375_v13  }
  0x3f   : > { %2132 = vset.pattern.permute.xlu1 %v2239_v3  ;;  %400 = vperm.xlu0 %2129, %v2380_v14  }
  0x40   : > { %526 = vperm.xlu1 %2132, %v284_v12  }
  0x43   : > { %410 = vperm.xlu0 %2129, %v2385_v15  }
  0x44   : > { %530 = vperm.xlu1 %2132, %v2355_v6  }
  0x47   : > { %420 = vperm.xlu0 %2129, %v2390_v16  }
  0x48   : > { %2133 = vset.pattern.permute.xlu1 %v2240_v5 }
  0x49   : > { %722 = vperm.xlu1 %2133, %v284_v12  }
  0x4b   : > { %430 = vperm.xlu0 %2129, %v2395_v17  }
  0x4d   : > { %2134 = vset.pattern.permute.xlu1 %v2238_v0 }
  0x4e   : > { %345 = vperm.xlu1 %2134, %v286_v18  }
  0x4f   : > { %440 = vperm.xlu0 %2129, %v2400_v19  }
  0x52   : > { %2135 = vset.pattern.permute.xlu1 %v2239_v3 }
  0x53   : > { %534 = vperm.xlu1 %2135, %v286_v18   ;;  %450 = vperm.xlu0 %2129, %v2405_v20  }
  0x57   : > { %538 = vperm.xlu1 %2135, %v287_v8   ;;  %460 = vperm.xlu0 %2129, %v2410_v21  }
  0x5b   : > { %2136 = vset.pattern.permute.xlu1 %v2240_v5  ;;  %470 = vperm.xlu0 %2129, %v2414_v22  }
  0x5c   : > { %730 = vperm.xlu1 %2136, %v286_v18  }
  0x5f   : > { %2172 = vset.pattern.permute.xlu0 %v2240_v5 }
  0x60   : > { %2137 = vset.pattern.permute.xlu1 %v2238_v0  ;;  %710 = vperm.xlu0 %2172, %v2341_v1  }
  0x61   : > { %355 = vperm.xlu1 %2137, %v288_v23  }
  0x64   : > { %718 = vperm.xlu0 %2172, %v2349_v4  }
  0x65   : > { %2138 = vset.pattern.permute.xlu1 %v2239_v3 }
  0x66   : > { %542 = vperm.xlu1 %2138, %v288_v23  }
  0x68   : > { %726 = vperm.xlu0 %2172, %v2355_v6  }
  0x6a   : > { %546 = vperm.xlu1 %2138, %v289_v9  }
  0x6c   : > { %734 = vperm.xlu0 %2172, %v287_v8  }
  0x6e   : > { %2139 = vset.pattern.permute.xlu1 %v2240_v5 }
  0x6f   : > { %738 = vperm.xlu1 %2139, %v288_v23  }
  0x70   : > { %742 = vperm.xlu0 %2172, %v289_v9  }
  0x73   : > { %2140 = vset.pattern.permute.xlu1 %v2238_v0 }
  0x74   : > { %365 = vperm.xlu1 %2140, %v290_v27   ;;  %750 = vperm.xlu0 %2172, %v2364_v10  }
  0x78   : > { %2141 = vset.pattern.permute.xlu1 %v2239_v3  ;;  %758 = vperm.xlu0 %2172, %v2369_v11  }
  0x79   : > { %550 = vperm.xlu1 %2141, %v290_v27  }
  0x7c   : > { %766 = vperm.xlu0 %2172, %v2375_v13  }
  0x7d   : > { %554 = vperm.xlu1 %2141, %v2364_v10  }
  0x80   : > { %774 = vperm.xlu0 %2172, %v2380_v14  }
  0x81   : > { %2142 = vset.pattern.permute.xlu1 %v2240_v5 }
  0x82   : > { %746 = vperm.xlu1 %2142, %v290_v27  }
  0x84   : > { %782 = vperm.xlu0 %2172, %v2385_v15  }
  0x86   : > { %2143 = vset.pattern.permute.xlu1 %v2238_v0 }
  0x87   : > { %375 = vperm.xlu1 %2143, %v292_v28  }
  0x88   : > { %790 = vperm.xlu0 %2172, %v2390_v16  }
  0x8b   : > { %2144 = vset.pattern.permute.xlu1 %v2239_v3 }
  0x8c   : > { %558 = vperm.xlu1 %2144, %v292_v28   ;;  %798 = vperm.xlu0 %2172, %v2395_v17  }
  0x90   : > { %562 = vperm.xlu1 %2144, %v2369_v11   ;;  %806 = vperm.xlu0 %2172, %v2400_v19  }
  0x94   : > { %2145 = vset.pattern.permute.xlu1 %v2240_v5  ;;  %814 = vperm.xlu0 %2172, %v2405_v20  }
  0x95   : > { %754 = vperm.xlu1 %2145, %v292_v28  }
  0x98   : > { %v2455_v34 = vpop.permute.xlu1 %320  ;;  %v316_v35 = vpop.permute.xlu0 %315  ;;  %822 = vperm.xlu0 %2172, %v2410_v21  }
  0x99   : > { %2146 = vset.pattern.permute.xlu1 %v2238_v0  ;;  %v477_v40 = vmul.f32 %v2459_v37, %v316_v35  ;;  %v478_v33 = vmul.f32 %v2459_v37, %v2455_v34 }
  0x9a   : > { %385 = vperm.xlu1 %2146, %v294_v32  }
  0x9c   : > { %830 = vperm.xlu0 %2172, %v2414_v22  }
  0x9d   : > { %v2465_v41 = vpop.permute.xlu1 %514  ;;  %v511_v42 = vpop.permute.xlu0 %510 }
  0x9e   : > { %2147 = vset.pattern.permute.xlu1 %v2239_v3  ;;  %v641_v43 = vmul.f32 %v2461_v39, %v511_v42  ;;  %v642_v30 = vmul.f32 %v2461_v39, %v2465_v41 }
  0x9f   : > { %566 = vperm.xlu1 %2147, %v294_v32  }
  0xa0   : > { %v673_v45 = vadd.f32 %v641_v43, %v477_v40  ;;  %v674_v42 = vadd.f32 %v642_v30, %v478_v33 }
  0xa2   : > { %v707_v46 = vpop.permute.xlu1 %706  ;;  %v2471_v47 = vpop.permute.xlu0 %330 }
  0xa3   : > { %v837_v48 = vmul.f32 %v2469_v44, %v707_v46  ;;  %570 = vperm.xlu1 %2147, %v2375_v13   ;;  %v480_v43 = vmul.f32 %v2459_v37, %v2471_v47 }
  0xa5   : > { %v869_v50 = vadd.f32 %v837_v48, %v673_v45 }
  0xa6   : > { %v2480_v51 = vpop.permute.xlu0 %340 }
  0xa7   : > { %2148 = vset.pattern.permute.xlu1 %v2240_v5  ;;  %v326_v52 = vpop.permute.xlu1 %325  ;;  %v908_v53 = vadd.f32 %v2478_v49, %v869_v50  ;;  %v482_v48 = vmul.f32 %v2459_v37, %v2480_v51 }
  0xa8   : > { %762 = vperm.xlu1 %2148, %v294_v32   ;;  %v479_v27 = vmul.f32 %v2459_v37, %v326_v52 }
  0xa9   : > { %v940_v54 = vmax.f32 %v908_v53, 0.0 }
  0xaa   : > { %v2484_v55 = vpop.permute.xlu0 %350 }
  0xab   : > { %1938 = vmatprep.mubr.msk.f32.mxu0 %vm981_vm0, %v940_v54 }
  0xac   : > { %2149 = vset.pattern.permute.xlu1 %v2238_v0  ;;  %v519_v57 = vpop.permute.xlu1 %518 }
  0xad   : > { %395 = vperm.xlu1 %2149, %v296_v56  }
  0xae   : > { %v2489_v58 = vpop.permute.xlu0 %360 }
  0xb0   : > { %v523_v59 = vpop.permute.xlu1 %522 }
  0xb1   : > { %2150 = vset.pattern.permute.xlu1 %v2239_v3  ;;  %v644_v41 = vmul.f32 %v2461_v39, %v523_v59 }
  0xb2   : > { %574 = vperm.xlu1 %2150, %v296_v56   ;;  %v2492_v60 = vpop.permute.xlu0 %370 }
  0xb3   : > { %v676_v59 = vadd.f32 %v644_v41, %v480_v43 }
  0xb5   : > { %v715_v61 = vpop.permute.xlu1 %714 }
  0xb6   : > { %578 = vperm.xlu1 %2150, %v2380_v14   ;;  %v2495_v62 = vpop.permute.xlu0 %380  ;;  %v300_v14 = vld [vmem:[%s2338_s17 + $0xa0] sm:$0xff]  ;;  %v839_v28 = vmul.f32 %v2469_v44, %v715_v61 }
  0xba   : > { %2151 = vset.pattern.permute.xlu1 %v2240_v5  ;;  %v336_v63 = vpop.permute.xlu1 %335  ;;  %v2498_v1 = vpop.permute.xlu0 %390 }
  0xbb   : > { %770 = vperm.xlu1 %2151, %v296_v56   ;;  %v481_v36 = vmul.f32 %v2459_v37, %v336_v63 }
  0xbe   : > { %v2501_v4 = vpop.permute.xlu0 %400 }
  0xbf   : > { %2152 = vset.pattern.permute.xlu1 %v2238_v0  ;;  %v527_v6 = vpop.permute.xlu1 %526 }
  0xc0   : > { %405 = vperm.xlu1 %2152, %v298_v2   ;;  %v645_v32 = vmul.f32 %v2461_v39, %v527_v6 }
  0xc2   : > { %v2504_v7 = vpop.permute.xlu0 %410  ;;  %v677_v46 = vadd.f32 %v645_v32, %v481_v36 }
  0xc3   : > { %v531_v8 = vpop.permute.xlu1 %530 }
  0xc4   : > { %2153 = vset.pattern.permute.xlu1 %v2239_v3  ;;  %v646_v61 = vmul.f32 %v2461_v39, %v531_v8 }
  0xc5   : > { %582 = vperm.xlu1 %2153, %v298_v2  }
  0xc6   : > { %v2507_v9 = vpop.permute.xlu0 %420  ;;  %v678_v8 = vadd.f32 %v646_v61, %v482_v48 }
  0xc8   : > { %v723_v10 = vpop.permute.xlu1 %722 }
  0xc9   : > { %586 = vperm.xlu1 %2153, %v2385_v15   ;;  %v643_v15 = vmul.f32 %v2461_v39, %v519_v57  ;;  %v841_v38 = vmul.f32 %v2469_v44, %v723_v10  ;;  %v302_v57 = vld [vmem:[%s2338_s17 + $0xb0] sm:$0xff] }
  0xca   : > { %v2510_v11 = vpop.permute.xlu0 %430 }
  0xcb   : > { %v675_v31 = vadd.f32 %v643_v15, %v479_v27  ;;  %v873_v53 = vadd.f32 %v841_v38, %v677_v46 }
  0xcd   : > { %2154 = vset.pattern.permute.xlu1 %v2240_v5  ;;  %v346_v12 = vpop.permute.xlu1 %345  ;;  %v871_v35 = vadd.f32 %v839_v28, %v675_v31  ;;  %v912_v15 = vadd.f32 %v2478_v49, %v873_v53 }
  0xce   : > { %778 = vperm.xlu1 %2154, %v298_v2   ;;  %v2513_v13 = vpop.permute.xlu0 %440  ;;  %v483_v47 = vmul.f32 %v2459_v37, %v346_v12  ;;  %v484_v12 = vmul.f32 %v2459_v37, %v2484_v55  ;;  %v486_v55 = vmul.f32 %v2459_v37, %v2489_v58 }
  0xcf   : > { %v910_v52 = vadd.f32 %v2478_v49, %v871_v35  ;;  %v944_v36 = vmax.f32 %v912_v15, 0.0  ;;  %v488_v15 = vmul.f32 %v2459_v37, %v2492_v60 }
  0xd2   : > { %2155 = vset.pattern.permute.xlu1 %v2238_v0  ;;  %v535_v18 = vpop.permute.xlu1 %534  ;;  %v2517_v23 = vpop.permute.xlu0 %450 }
  0xd3   : > { %415 = vperm.xlu1 %2155, %v300_v14   ;;  %v647_v34 = vmul.f32 %v2461_v39, %v535_v18  ;;  %v942_v18 = vmax.f32 %v910_v52, 0.0 }
  0xd5   : > { %v679_v6 = vadd.f32 %v647_v34, %v483_v47 }
  0xd6   : > { %v539_v24 = vpop.permute.xlu1 %538  ;;  %v2519_v25 = vpop.permute.xlu0 %460 }
  0xd7   : > { %2156 = vset.pattern.permute.xlu1 %v2239_v3 }
  0xd8   : > { %590 = vperm.xlu1 %2156, %v300_v14  }
  0xda   : > { %v2523_v26 = vpop.permute.xlu0 %470 }
  0xdb   : > { %v731_v29 = vpop.permute.xlu1 %730 }
  0xdc   : > { %594 = vperm.xlu1 %2156, %v2390_v16   ;;  %v843_v54 = vmul.f32 %v2469_v44, %v731_v29  ;;  %v648_v29 = vmul.f32 %v2461_v39, %v539_v24 }
  0xde   : > { %v875_v27 = vadd.f32 %v843_v54, %v679_v6 }
  0xdf   : > { %v711_v40 = vpop.permute.xlu0 %710 }
  0xe0   : > { %v838_v16 = vmul.f32 %v2469_v44, %v711_v40  ;;  %2157 = vset.pattern.permute.xlu1 %v2240_v5  ;;  %v356_v45 = vpop.permute.xlu1 %355  ;;  %v914_v38 = vadd.f32 %v2478_v49, %v875_v27 }
  0xe1   : > { %786 = vperm.xlu1 %2157, %v300_v14   ;;  %v485_v46 = vmul.f32 %v2459_v37, %v356_v45 }
  0xe2   : > { %v870_v50 = vadd.f32 %v838_v16, %v674_v42  ;;  %v680_v42 = vadd.f32 %v648_v29, %v484_v12 }
  0xe3   : > { %v719_v56 = vpop.permute.xlu0 %718 }
  0xe4   : > { %v909_v63 = vadd.f32 %v2478_v49, %v870_v50  ;;  %v840_v2 = vmul.f32 %v2469_v44, %v719_v56  ;;  %v946_v50 = vmax.f32 %v914_v38, 0.0 }
  0xe5   : > { %2158 = vset.pattern.permute.xlu1 %v2238_v0  ;;  %v543_v51 = vpop.permute.xlu1 %542 }
  0xe6   : > { %v941_v10 = vmax.f32 %v909_v63, 0.0  ;;  %v872_v14 = vadd.f32 %v840_v2, %v676_v59  ;;  %425 = vperm.xlu1 %2158, %v302_v57   ;;  %v649_v24 = vmul.f32 %v2461_v39, %v543_v51 }
  0xe7   : > { %v727_v28 = vpop.permute.xlu0 %726 }
  0xe8   : > { %v911_v30 = vadd.f32 %v2478_v49, %v872_v14  ;;  %v842_v31 = vmul.f32 %v2469_v44, %v727_v28  ;;  %1939 = vmatmul.mubr.msk.f32.vlgmr.msra.gmra.mrb[0].mxu0 %vm981_vm0, %v941_v10  ;;  %v681_v52 = vadd.f32 %v649_v24, %v485_v46  ;;  %v304_v14 = vld [vmem:[%s2338_s17 + $0xc0] sm:$0xff] }
  0xe9   : > { %v547_v32 = vpop.permute.xlu1 %546  ;;  %1941 = vmatprep.mubr.msk.f32.mxu0 %vm981_vm0, %v942_v18 }
  0xea   : > { %v943_v33 = vmax.f32 %v911_v30, 0.0  ;;  %v874_v35 = vadd.f32 %v842_v31, %v678_v8  ;;  %2159 = vset.pattern.permute.xlu1 %v2239_v3  ;;  %v650_v41 = vmul.f32 %v2461_v39, %v547_v32 }
  0xeb   : > { %598 = vperm.xlu1 %2159, %v302_v57   ;;  %v735_v40 = vpop.permute.xlu0 %734 }
  0xec   : > { %v913_v43 = vadd.f32 %v2478_v49, %v874_v35  ;;  %v844_v16 = vmul.f32 %v2469_v44, %v735_v40  ;;  %1942 = vmatmul.mubr.msk.f32.gmra.mrb[2].mxu0 %vm981_vm0, %v943_v33  ;;  %v682_v54 = vadd.f32 %v650_v41, %v486_v55  ;;  %v490_v41 = vmul.f32 %v2459_v37, %v2495_v62 }
  0xed   : > { %1944 = vmatprep.mubr.msk.f32.mxu0 %vm981_vm0, %v944_v36 }
  0xee   : > { %v945_v58 = vmax.f32 %v913_v43, 0.0  ;;  %v876_v34 = vadd.f32 %v844_v16, %v680_v42  ;;  %v739_v48 = vpop.permute.xlu1 %738  ;;  %v306_v42 = vld [vmem:[%s2338_s17 + $0xd0] sm:$0xff] }
  0xef   : > { %v845_v53 = vmul.f32 %v2469_v44, %v739_v48  ;;  %602 = vperm.xlu1 %2159, %v2395_v17   ;;  %v743_v47 = vpop.permute.xlu0 %742 }
  0xf0   : > { %v915_v56 = vadd.f32 %v2478_v49, %v876_v34  ;;  %v846_v59 = vmul.f32 %v2469_v44, %v743_v47  ;;  %1945 = vmatmul.mubr.msk.f32.gmra.mrb[4].mxu0 %vm981_vm0, %v945_v58 }
  0xf1   : > { %v877_v45 = vadd.f32 %v845_v53, %v681_v52  ;;  %1947 = vmatprep.mubr.msk.f32.mxu0 %vm981_vm0, %v946_v50 }
  0xf2   : > { %v947_v61 = vmax.f32 %v915_v56, 0.0  ;;  %v878_v63 = vadd.f32 %v846_v59, %v682_v54 }
  0xf3   : > { %v916_v2 = vadd.f32 %v2478_v49, %v877_v45  ;;  %2160 = vset.pattern.permute.xlu1 %v2240_v5  ;;  %v366_v6 = vpop.permute.xlu1 %365  ;;  %v751_v18 = vpop.permute.xlu0 %750 }
  0xf4   : > { %v917_v17 = vadd.f32 %v2478_v49, %v878_v63  ;;  %794 = vperm.xlu1 %2160, %v302_v57   ;;  %1948 = vmatmul.mubr.msk.f32.gmra.mrb[6].mxu0 %vm981_vm0, %v947_v61  ;;  %v848_v28 = vmul.f32 %v2469_v44, %v751_v18  ;;  %v487_v30 = vmul.f32 %v2459_v37, %v366_v6 }
  0xf5   : > { %v948_v51 = vmax.f32 %v916_v2, 0.0  ;;  %v308_v2 = vld [vmem:[%s2338_s17 + $0xe0] sm:$0xff] }
  0xf6   : > { %v949_v10 = vmax.f32 %v917_v17, 0.0  ;;  %v492_v17 = vmul.f32 %v2459_v37, %v2498_v1 }
  0xf7   : > { %1950 = vmatprep.mubr.msk.f32.mxu0 %vm981_vm0, %v948_v51 }
  0xf8   : > { %2161 = vset.pattern.permute.xlu1 %v2238_v0  ;;  %v551_v12 = vpop.permute.xlu1 %550  ;;  %1951 = vmatmul.mubr.msk.f32.gmra.mrb[8].mxu0 %vm981_vm0, %v949_v10 }
  0xf9   : > { %435 = vperm.xlu1 %2161, %v304_v14   ;;  %v651_v8 = vmul.f32 %v2461_v39, %v551_v12 }
  0xfb   : > { %v683_v33 = vadd.f32 %v651_v8, %v487_v30 }
  0xfc   : > { %v555_v27 = vpop.permute.xlu1 %554 }
  0xfd   : > { %v652_v57 = vmul.f32 %v2461_v39, %v555_v27  ;;  %2162 = vset.pattern.permute.xlu1 %v2239_v3 }
  0xfe   : > { %606 = vperm.xlu1 %2162, %v304_v14  }
  0xff   : > { %v684_v29 = vadd.f32 %v652_v57, %v488_v15 }
 0x101   : > { %v880_v31 = vadd.f32 %v848_v28, %v684_v29  ;;  %v747_v32 = vpop.permute.xlu1 %746 }
 0x102   : > { %v847_v35 = vmul.f32 %v2469_v44, %v747_v32  ;;  %610 = vperm.xlu1 %2162, %v2400_v19   ;;  %v759_v19 = vpop.permute.xlu0 %758 }
 0x103   : > { %v919_v55 = vadd.f32 %v2478_v49, %v880_v31  ;;  %v850_v58 = vmul.f32 %v2469_v44, %v759_v19  ;;  %v1337_v19 = vld [vmem:[%s2947_s5 + $0x10] sm:$0xff] }
 0x104   : > { %v879_v60 = vadd.f32 %v847_v35, %v683_v33  ;;  %v310_v35 = vld [vmem:[%s2338_s17 + $0xf0] sm:$0xff]  ;;  %s1784_s17 = sshll.u32 %s270_s16, 8 }
 0x105   : > { %v951_v40 = vmax.f32 %v919_v55, 0.0  ;;  %v1335_v55 = vld [vmem:[%s2947_s5] sm:$0xff]  ;;  %s2822_s20 = scalar_lea.vmem [#allocation2], %s1784_s17 }
 0x106   : > { %v918_v36 = vadd.f32 %v2478_v49, %v879_v60  ;;  %2163 = vset.pattern.permute.xlu1 %v2240_v5  ;;  %v376_v38 = vpop.permute.xlu1 %375  ;;  %s1718_s22 = sshll.u32 %s2822_s20, 4  ;;  %s2894_s22 = int_to_ptr.vmem [resolvable:$true] %s1718_s22 }
 0x107   : > { %802 = vperm.xlu1 %2163, %v304_v14   ;;  %v489_v50 = vmul.f32 %v2459_v37, %v376_v38  ;;  %v494_v38 = vmul.f32 %v2459_v37, %v2501_v4  ;;  %v1338_v4 = vld [vmem:[%s2947_s5 + $0x18] sm:$0xff]  ;;  %s2174_s9 = scalar_lea.vmem %s2894_s22, 4096  ;;  %p2181_p0 = scmp.lt.s32.totalorder %s2894_s22, %s2179_s14 }
 0x108   : > { %v950_v24 = vmax.f32 %v918_v36, 0.0  ;;  %v1336_v36 = vld [vmem:[%s2947_s5 + $0x8] sm:$0xff]  ;;  %p2175_p11 = scmp.ne.s32.totalorder %s2894_s22, %s2174_s9  ;;  %p2182_p1 = scmp.lt.s32.totalorder %s2180_s15, %s2174_s9 }
 0x10a   : > { %1953 = vmatprep.mubr.msk.f32.mxu0 %vm981_vm0, %v950_v24  ;;  %v2054_v24 = vpack.c.bf16 %v1336_v36, %v1335_v55  ;;  %p2176_p12 = pnand %p2175_p11, %p2322_p5  ;;  %p2183_p2 = por %p2182_p1, %p2181_p0 }
 0x10b   : > { %2164 = vset.pattern.permute.xlu1 %v2238_v0  ;;  %v559_v43 = vpop.permute.xlu1 %558  ;;  %1954 = vmatmul.mubr.msk.f32.gmra.mrb[10].mxu0 %vm981_vm0, %v951_v40 }
 0x10c   : > { %445 = vperm.xlu1 %2164, %v306_v42   ;;  %v653_v34 = vmul.f32 %v2461_v39, %v559_v43  ;;  %2070 = vmatprep.subr.bf16.mxu1 %v2054_v24  ;;  %p2177_p13 = pneg %p2176_p12 }
 0x10d   : > { %2074 = vmatpush3.bf16.msra.mxu1 %v2054_v24  ;;  %2055 = vmatprep.subr.bf16.mxu0 %v2054_v24 }
 0x10e   : > { %v685_v47 = vadd.f32 %v653_v34, %v489_v50  ;;  %2057 = vmatpush3.bf16.msra.mxu0 %v2054_v24  ;;  %v1339_v50 = vld [vmem:[%s2947_s5 + $0x20] sm:$0xff]  ;;  %p2184_p3 = pnand %p2183_p2, %p2177_p13 }
 0x10f   : > { %v563_v16 = vpop.permute.xlu1 %562 }
 0x110   : > { %v654_v46 = vmul.f32 %v2461_v39, %v563_v16  ;;  %2165 = vset.pattern.permute.xlu1 %v2239_v3  ;;  %v2058_v16 = vpack.c.bf16 %v1338_v4, %v1337_v19 }
 0x111   : > { %614 = vperm.xlu1 %2165, %v306_v42  }
 0x112   : > { %v686_v48 = vadd.f32 %v654_v46, %v490_v41  ;;  %2071 = vmatprep.subr.bf16.mxu1 %v2058_v16  ;;  %2059 = vmatprep.subr.bf16.mxu0 %v2058_v16 }
 0x113   : > { %2075 = vmatpush3.bf16.msra.mxu1 %v2058_v16  ;;  %2061 = vmatpush3.bf16.msra.mxu0 %v2058_v16 }
 0x114   : > { %v882_v52 = vadd.f32 %v850_v58, %v686_v48  ;;  %v755_v53 = vpop.permute.xlu1 %754 }
 0x115   : > { %v849_v54 = vmul.f32 %v2469_v44, %v755_v53  ;;  %618 = vperm.xlu1 %2165, %v2405_v20   ;;  %v767_v20 = vpop.permute.xlu0 %766 }
 0x116   : > { %v921_v56 = vadd.f32 %v2478_v49, %v882_v52  ;;  %v852_v14 = vmul.f32 %v2469_v44, %v767_v20  ;;  %v1340_v52 = vld [vmem:[%s2947_s5 + $0x28] sm:$0xff] }
 0x117   : > { %v881_v62 = vadd.f32 %v849_v54, %v685_v47  ;;  %v2062_v53 = vpack.c.bf16 %v1340_v52, %v1339_v50 }
 0x118   : > { %v953_v63 = vmax.f32 %v921_v56, 0.0  ;;  %v1341_v56 = vld [vmem:[%s2947_s5 + $0x30] sm:$0xff] }
 0x119   : > { %v920_v59 = vadd.f32 %v2478_v49, %v881_v62  ;;  %2166 = vset.pattern.permute.xlu1 %v2240_v5  ;;  %v386_v45 = vpop.permute.xlu1 %385  ;;  %2072 = vmatprep.subr.bf16.mxu1 %v2062_v53 }
 0x11a   : > { %810 = vperm.xlu1 %2166, %v306_v42   ;;  %v491_v15 = vmul.f32 %v2459_v37, %v386_v45  ;;  %2063 = vmatprep.subr.bf16.mxu0 %v2062_v53 }
 0x11b   : > { %v952_v61 = vmax.f32 %v920_v59, 0.0  ;;  %2076 = vmatpush3.bf16.msra.mxu1 %v2062_v53  ;;  %v1342_v59 = vld [vmem:[%s2947_s5 + $0x38] sm:$0xff]  ;;  %2065 = vmatpush3.bf16.msra.mxu0 %v2062_v53 }
 0x11c   : > { %v2066_v45 = vpack.c.bf16 %v1342_v59, %v1341_v56 }
 0x11d   : > { %1956 = vmatprep.mubr.msk.f32.mxu0 %vm981_vm0, %v952_v61 }
 0x11e   : > { %2167 = vset.pattern.permute.xlu1 %v2238_v0  ;;  %v567_v6 = vpop.permute.xlu1 %566  ;;  %1957 = vmatmul.mubr.msk.f32.gmra.mrb[12].mxu0 %vm981_vm0, %v953_v63 }
 0x11f   : > { %455 = vperm.xlu1 %2167, %v308_v2   ;;  %v655_v12 = vmul.f32 %v2461_v39, %v567_v6  ;;  %2073 = vmatprep.subr.bf16.mxu1 %v2066_v45  ;;  %v496_v6 = vmul.f32 %v2459_v37, %v2504_v7 }
 0x120   : > { %2067 = vmatprep.subr.bf16.mxu0 %v2066_v45  ;;  %2077 = vmatpush3.bf16.msra.mxu1 %v2066_v45 }
 0x121   : > { %v687_v28 = vadd.f32 %v655_v12, %v491_v15  ;;  %2069 = vmatpush3.bf16.msra.mxu0 %v2066_v45 }
 0x122   : > { %v571_v51 = vpop.permute.xlu1 %570 }
 0x123   : > { %v656_v10 = vmul.f32 %v2461_v39, %v571_v51  ;;  %2168 = vset.pattern.permute.xlu1 %v2239_v3 }
 0x124   : > { %622 = vperm.xlu1 %2168, %v308_v2  }
 0x125   : > { %v688_v18 = vadd.f32 %v656_v10, %v492_v17 }
 0x127   : > { %v884_v27 = vadd.f32 %v852_v14, %v688_v18  ;;  %v763_v57 = vpop.permute.xlu1 %762 }
 0x128   : > { %v851_v8 = vmul.f32 %v2469_v44, %v763_v57  ;;  %626 = vperm.xlu1 %2168, %v2410_v21   ;;  %v775_v21 = vpop.permute.xlu0 %774 }
 0x129   : > { %v923_v29 = vadd.f32 %v2478_v49, %v884_v27  ;;  %v854_v42 = vmul.f32 %v2469_v44, %v775_v21 }
 0x12a   : > { %v883_v1 = vadd.f32 %v851_v8, %v687_v28 }
 0x12b   : > { %v955_v33 = vmax.f32 %v923_v29, 0.0 }
 0x12c   : > { %v922_v30 = vadd.f32 %v2478_v49, %v883_v1  ;;  %2169 = vset.pattern.permute.xlu1 %v2240_v5  ;;  %v396_v31 = vpop.permute.xlu1 %395 }
 0x12d   : > { %818 = vperm.xlu1 %2169, %v308_v2   ;;  %v783_v2 = vpop.permute.xlu0 %782 }
 0x12e   : > { %v954_v32 = vmax.f32 %v922_v30, 0.0  ;;  %v856_v51 = vmul.f32 %v2469_v44, %v783_v2 }
 0x130   : > { %1959 = vmatprep.mubr.msk.f32.mxu0 %vm981_vm0, %v954_v32 }
 0x131   : > { %2170 = vset.pattern.permute.xlu1 %v2238_v0  ;;  %v575_v60 = vpop.permute.xlu1 %574  ;;  %1960 = vmatmul.mubr.msk.f32.gmra.mrb[14].mxu0 %vm981_vm0, %v955_v33  ;;  %v791_v32 = vpop.permute.xlu0 %790 }
 0x132   : > { %465 = vperm.xlu1 %2170, %v310_v35   ;;  %v657_v43 = vmul.f32 %v2461_v39, %v575_v60  ;;  %v858_v21 = vmul.f32 %v2469_v44, %v791_v32 }
 0x135   : > { %v579_v40 = vpop.permute.xlu1 %578 }
 0x136   : > { %v658_v0 = vmul.f32 %v2461_v39, %v579_v40  ;;  %2171 = vset.pattern.permute.xlu1 %v2239_v3  ;;  %v493_v3 = vmul.f32 %v2459_v37, %v396_v31 }
 0x137   : > { %630 = vperm.xlu1 %2171, %v310_v35  }
 0x138   : > { %v690_v41 = vadd.f32 %v658_v0, %v494_v38  ;;  %v689_v34 = vadd.f32 %v657_v43, %v493_v3 }
 0x13a   : > { %v886_v46 = vadd.f32 %v854_v42, %v690_v41  ;;  %v771_v58 = vpop.permute.xlu1 %770 }
 0x13b   : > { %v853_v48 = vmul.f32 %v2469_v44, %v771_v58  ;;  %634 = vperm.xlu1 %2171, %v2414_v22  }
 0x13c   : > { %v925_v54 = vadd.f32 %v2478_v49, %v886_v46  ;;  %v799_v46 = vpop.permute.xlu0 %798 }
 0x13d   : > { %v885_v47 = vadd.f32 %v853_v48, %v689_v34  ;;  %v500_v34 = vmul.f32 %v2459_v37, %v2510_v11  ;;  %v860_v50 = vmul.f32 %v2469_v44, %v799_v46  ;;  %v506_v46 = vmul.f32 %v2459_v37, %v2519_v25 }
 0x13e   : > { %v957_v63 = vmax.f32 %v925_v54, 0.0 }
 0x13f   : > { %v924_v62 = vadd.f32 %v2478_v49, %v885_v47  ;;  %2173 = vset.pattern.permute.xlu1 %v2240_v5  ;;  %v406_v22 = vpop.permute.xlu1 %405 }
 0x140   : > { %826 = vperm.xlu1 %2173, %v310_v35   ;;  %v495_v12 = vmul.f32 %v2459_v37, %v406_v22  ;;  %v498_v35 = vmul.f32 %v2459_v37, %v2507_v9 }
 0x141   : > { %v956_v61 = vmax.f32 %v924_v62, 0.0 }
 0x143   : > { %1962 = vmatprep.mubr.msk.f32.mxu0 %vm981_vm0, %v956_v61 }
 0x144   : > { %v583_v5 = vpop.permute.xlu1 %582  ;;  %1963 = vmatmul.mubr.msk.f32.gmra.mrb[16].mxu0 %vm981_vm0, %v957_v63 }
 0x145   : > { %v659_v10 = vmul.f32 %v2461_v39, %v583_v5 }
 0x147   : > { %v691_v27 = vadd.f32 %v659_v10, %v495_v12 }
 0x148   : > { %v587_v20 = vpop.permute.xlu1 %586 }
 0x149   : > { %v660_v17 = vmul.f32 %v2461_v39, %v587_v20 }
 0x14b   : > { %v692_v14 = vadd.f32 %v660_v17, %v496_v6  ;;  %v807_v6 = vpop.permute.xlu0 %806  ;;  %v502_v17 = vmul.f32 %v2459_v37, %v2513_v13 }
 0x14d   : > { %v888_v18 = vadd.f32 %v856_v51, %v692_v14  ;;  %v779_v15 = vpop.permute.xlu1 %778  ;;  %v862_v51 = vmul.f32 %v2469_v44, %v807_v6  ;;  %v508_v6 = vmul.f32 %v2459_v37, %v2523_v26 }
 0x14e   : > { %v855_v57 = vmul.f32 %v2469_v44, %v779_v15 }
 0x14f   : > { %v927_v8 = vadd.f32 %v2478_v49, %v888_v18 }
 0x150   : > { %v887_v28 = vadd.f32 %v855_v57, %v691_v27 }
 0x151   : > { %v959_v30 = vmax.f32 %v927_v8, 0.0 }
 0x152   : > { %v926_v7 = vadd.f32 %v2478_v49, %v887_v28  ;;  %v416_v1 = vpop.permute.xlu1 %415 }
 0x153   : > { %v497_v38 = vmul.f32 %v2459_v37, %v416_v1 }
 0x154   : > { %v958_v29 = vmax.f32 %v926_v7, 0.0 }
 0x156   : > { %1965 = vmatprep.mubr.msk.f32.mxu0 %vm981_vm0, %v958_v29 }
 0x157   : > { %v591_v31 = vpop.permute.xlu1 %590  ;;  %1966 = vmatmul.mubr.msk.f32.gmra.mrb[18].mxu0 %vm981_vm0, %v959_v30 }
 0x158   : > { %v661_v55 = vmul.f32 %v2461_v39, %v591_v31 }
 0x15a   : > { %v693_v0 = vadd.f32 %v661_v55, %v497_v38 }
 0x15b   : > { %v595_v33 = vpop.permute.xlu1 %594 }
 0x15c   : > { %v662_v60 = vmul.f32 %v2461_v39, %v595_v33  ;;  %v504_v33 = vmul.f32 %v2459_v37, %v2517_v23 }
 0x15e   : > { %v694_v36 = vadd.f32 %v662_v60, %v498_v35  ;;  %v815_v60 = vpop.permute.xlu0 %814 }
 0x15f   : > { %v864_v55 = vmul.f32 %v2469_v44, %v815_v60 }
 0x160   : > { %v890_v24 = vadd.f32 %v858_v21, %v694_v36  ;;  %v787_v40 = vpop.permute.xlu1 %786 }
 0x161   : > { %v857_v42 = vmul.f32 %v2469_v44, %v787_v40 }
 0x162   : > { %v929_v19 = vadd.f32 %v2478_v49, %v890_v24 }
 0x163   : > { %v889_v43 = vadd.f32 %v857_v42, %v693_v0 }
 0x164   : > { %v961_v16 = vmax.f32 %v929_v19, 0.0 }
 0x165   : > { %v928_v4 = vadd.f32 %v2478_v49, %v889_v43  ;;  %v426_v9 = vpop.permute.xlu1 %425 }
 0x166   : > { %v499_v47 = vmul.f32 %v2459_v37, %v426_v9 }
 0x167   : > { %v960_v41 = vmax.f32 %v928_v4, 0.0 }
 0x169   : > { %1968 = vmatprep.mubr.msk.f32.mxu0 %vm981_vm0, %v960_v41 }
 0x16a   : > { %v599_v3 = vpop.permute.xlu1 %598  ;;  %1969 = vmatmul.mubr.msk.f32.gmra.mrb[20].mxu0 %vm981_vm0, %v961_v16 }
 0x16b   : > { %v663_v52 = vmul.f32 %v2461_v39, %v599_v3 }
 0x16d   : > { %v695_v22 = vadd.f32 %v663_v52, %v499_v47 }
 0x16e   : > { %v603_v58 = vpop.permute.xlu1 %602 }
 0x16f   : > { %v664_v48 = vmul.f32 %v2461_v39, %v603_v58 }
 0x171   : > { %v696_v53 = vadd.f32 %v664_v48, %v500_v34  ;;  %v823_v34 = vpop.permute.xlu0 %822 }
 0x173   : > { %v892_v54 = vadd.f32 %v860_v50, %v696_v53  ;;  %v795_v62 = vpop.permute.xlu1 %794  ;;  %v866_v50 = vmul.f32 %v2469_v44, %v823_v34 }
 0x174   : > { %v859_v56 = vmul.f32 %v2469_v44, %v795_v62 }
 0x175   : > { %v931_v45 = vadd.f32 %v2478_v49, %v892_v54 }
 0x176   : > { %v891_v59 = vadd.f32 %v859_v56, %v695_v22 }
 0x177   : > { %v963_v5 = vmax.f32 %v931_v45, 0.0 }
 0x178   : > { %v930_v61 = vadd.f32 %v2478_v49, %v891_v59  ;;  %v436_v11 = vpop.permute.xlu1 %435 }
 0x179   : > { %v501_v18 = vmul.f32 %v2459_v37, %v436_v11 }
 0x17a   : > { %v962_v63 = vmax.f32 %v930_v61, 0.0 }
 0x17c   : > { %1971 = vmatprep.mubr.msk.f32.mxu0 %vm981_vm0, %v962_v63 }
 0x17d   : > { %v607_v2 = vpop.permute.xlu1 %606  ;;  %1972 = vmatmul.mubr.msk.f32.gmra.mrb[22].mxu0 %vm981_vm0, %v963_v5  ;;  %v831_v5 = vpop.permute.xlu0 %830 }
 0x17e   : > { %v665_v14 = vmul.f32 %v2461_v39, %v607_v2 }
 0x180   : > { %v697_v57 = vadd.f32 %v665_v14, %v501_v18  ;;  %v868_v14 = vmul.f32 %v2469_v44, %v831_v5 }
 0x181   : > { %v611_v20 = vpop.permute.xlu1 %610 }
 0x182   : > { %v666_v10 = vmul.f32 %v2461_v39, %v611_v20 }
 0x184   : > { %v698_v12 = vadd.f32 %v666_v10, %v502_v17 }
 0x186   : > { %v894_v15 = vadd.f32 %v862_v51, %v698_v12  ;;  %v803_v27 = vpop.permute.xlu1 %802 }
 0x187   : > { %v861_v28 = vmul.f32 %v2469_v44, %v803_v27  ;;  %v2745_v27 = vld [vmem:[%s2946_s4] ss:$0 sm:$0xff] }
 0x188   : > { %v933_v7 = vadd.f32 %v2478_v49, %v894_v15 }
 0x189   : > { %v893_v8 = vadd.f32 %v861_v28, %v697_v57 }
 0x18a   : > { %v965_v30 = vmax.f32 %v933_v7, 0.0 }
 0x18b   : > { %v932_v1 = vadd.f32 %v2478_v49, %v893_v8  ;;  %v446_v13 = vpop.permute.xlu1 %445 }
 0x18c   : > { %v503_v38 = vmul.f32 %v2459_v37, %v446_v13 }
 0x18d   : > { %v964_v29 = vmax.f32 %v932_v1, 0.0 }
 0x18f   : > { %1974 = vmatprep.mubr.msk.f32.mxu0 %vm981_vm0, %v964_v29 }
 0x190   : > { %v615_v31 = vpop.permute.xlu1 %614  ;;  %1975 = vmatmul.mubr.msk.f32.gmra.mrb[24].mxu0 %vm981_vm0, %v965_v30 }
 0x191   : > { %v667_v21 = vmul.f32 %v2461_v39, %v615_v31 }
 0x193   : > { %v699_v0 = vadd.f32 %v667_v21, %v503_v38 }
 0x194   : > { %v619_v32 = vpop.permute.xlu1 %618 }
 0x195   : > { %v668_v35 = vmul.f32 %v2461_v39, %v619_v32 }
 0x197   : > { %v700_v36 = vadd.f32 %v668_v35, %v504_v33 }
 0x199   : > { %v896_v24 = vadd.f32 %v864_v55, %v700_v36  ;;  %v811_v40 = vpop.permute.xlu1 %810 }
 0x19a   : > { %v863_v42 = vmul.f32 %v2469_v44, %v811_v40 }
 0x19b   : > { %v935_v19 = vadd.f32 %v2478_v49, %v896_v24 }
 0x19c   : > { %v895_v43 = vadd.f32 %v863_v42, %v699_v0 }
 0x19d   : > { %v967_v41 = vmax.f32 %v935_v19, 0.0 }
 0x19e   : > { %v934_v23 = vadd.f32 %v2478_v49, %v895_v43  ;;  %v456_v4 = vpop.permute.xlu1 %455 }
 0x19f   : > { %v505_v53 = vmul.f32 %v2459_v37, %v456_v4 }
 0x1a0   : > { %v966_v9 = vmax.f32 %v934_v23, 0.0 }
 0x1a2   : > { %1977 = vmatprep.mubr.msk.f32.mxu0 %vm981_vm0, %v966_v9 }
 0x1a3   : > { %v623_v16 = vpop.permute.xlu1 %622  ;;  %1978 = vmatmul.mubr.msk.f32.gmra.mrb[26].mxu0 %vm981_vm0, %v967_v41 }
 0x1a4   : > { %v669_v48 = vmul.f32 %v2461_v39, %v623_v16 }
 0x1a6   : > { %v701_v62 = vadd.f32 %v669_v48, %v505_v53 }
 0x1a7   : > { %v627_v3 = vpop.permute.xlu1 %626 }
 0x1a8   : > { %v670_v58 = vmul.f32 %v2461_v39, %v627_v3 }
 0x1aa   : > { %v702_v52 = vadd.f32 %v670_v58, %v506_v46 }
 0x1ac   : > { %v898_v47 = vadd.f32 %v866_v50, %v702_v52  ;;  %v819_v54 = vpop.permute.xlu1 %818 }
 0x1ad   : > { %v865_v22 = vmul.f32 %v2469_v44, %v819_v54 }
 0x1ae   : > { %v937_v59 = vadd.f32 %v2478_v49, %v898_v47 }
 0x1af   : > { %v897_v56 = vadd.f32 %v865_v22, %v701_v62 }
 0x1b0   : > { %v969_v11 = vmax.f32 %v937_v59, 0.0 }
 0x1b1   : > { %v936_v25 = vadd.f32 %v2478_v49, %v897_v56  ;;  %v466_v45 = vpop.permute.xlu1 %465 }
 0x1b2   : > { %v507_v18 = vmul.f32 %v2459_v37, %v466_v45 }
 0x1b3   : > { %v968_v61 = vmax.f32 %v936_v25, 0.0 }
 0x1b5   : > { %1980 = vmatprep.mubr.msk.f32.mxu0 %vm981_vm0, %v968_v61 }
 0x1b6   : > { %v631_v63 = vpop.permute.xlu1 %630  ;;  %1981 = vmatmul.mubr.msk.f32.gmra.mrb[28].mxu0 %vm981_vm0, %v969_v11 }
 0x1b7   : > { %v671_v51 = vmul.f32 %v2461_v39, %v631_v63 }
 0x1b9   : > { %v703_v26 = vadd.f32 %v671_v51, %v507_v18 }
 0x1ba   : > { %v635_v2 = vpop.permute.xlu1 %634 }
 0x1bb   : > { %v672_v20 = vmul.f32 %v2461_v39, %v635_v2  ;;  %v1940_v17 = vpop.f32.mrb[0].mxu0 }
 0x1bc   : > { %v1144_v10 = vpop.f32.mrb[1].mxu0  ;;  %v1150_v36 = vadd.f32 %v1940_v17, %v2745_v27 }
 0x1bd   : > { %v704_v12 = vadd.f32 %v672_v20, %v508_v6  ;;  %v1145_v31 = vadd.f32 %v2745_v27, %v1144_v10 }
 0x1be   : > { %v1304_v19 = vmax.f32 %v1150_v36, 0.0 }
 0x1bf   : > { %v900_v15 = vadd.f32 %v868_v14, %v704_v12  ;;  %v827_v57 = vpop.permute.xlu1 %826  ;;  %v1943_v28 = vpop.f32.mrb[2].mxu0  ;;  %v1303_v40 = vmax.f32 %v1145_v31, 0.0 }
 0x1c0   : > { %v867_v8 = vmul.f32 %v2469_v44, %v827_v57  ;;  %v1160_v7 = vadd.f32 %v1943_v28, %v2745_v27  ;;  %v1154_v39 = vpop.f32.mrb[3].mxu0 }
 0x1c1   : > { %v1155_v1 = vadd.f32 %v2745_v27, %v1154_v39  ;;  %v939_v37 = vadd.f32 %v2478_v49, %v900_v15 }
 0x1c2   : > { %v899_v13 = vadd.f32 %v867_v8, %v703_v26  ;;  %v1306_v33 = vmax.f32 %v1160_v7, 0.0 }
 0x1c3   : > { %v1305_v29 = vmax.f32 %v1155_v1, 0.0  ;;  %v1946_v30 = vpop.f32.mrb[4].mxu0  ;;  %v971_v55 = vmax.f32 %v939_v37, 0.0 }
 0x1c4   : > { %v938_v32 = vadd.f32 %v2478_v49, %v899_v13  ;;  %v1170_v35 = vadd.f32 %v1946_v30, %v2745_v27  ;;  %v1164_v60 = vpop.f32.mrb[5].mxu0 }
 0x1c5   : > { %v1165_v44 = vadd.f32 %v2745_v27, %v1164_v60  ;;  %2005 = vmatprep.mubr.msk.f32.mxu1 %vm1350_vm1, %v1305_v29 }
 0x1c6   : > { %v970_v21 = vmax.f32 %v938_v32, 0.0  ;;  %2006 = vmatmul.mubr.msk.f32.vlgmr.msra.gmra.mrb[0].mxu1 %vm1350_vm1, %v1306_v33  ;;  %v1308_v0 = vmax.f32 %v1170_v35, 0.0 }
 0x1c7   : > { %v1307_v38 = vmax.f32 %v1165_v44, 0.0  ;;  %v1949_v24 = vpop.f32.mrb[6].mxu0 }
 0x1c8   : > { %v1180_v49 = vadd.f32 %v1949_v24, %v2745_v27  ;;  %v1174_v42 = vpop.f32.mrb[7].mxu0  ;;  %1983 = vmatprep.mubr.msk.f32.mxu0 %vm981_vm0, %v970_v21 }
 0x1c9   : > { %v1175_v43 = vadd.f32 %v2745_v27, %v1174_v42  ;;  %1984 = vmatmul.mubr.msk.f32.gmra.mrb[30].mxu0 %vm981_vm0, %v971_v55  ;;  %2008 = vmatprep.mubr.msk.f32.mxu1 %vm1350_vm1, %v1307_v38 }
 0x1ca   : > { %2002 = vmatprep.mubr.msk.f32.mxu0 %vm1350_vm1, %v1303_v40  ;;  %2009 = vmatmul.mubr.msk.f32.gmra.mrb[2].mxu1 %vm1350_vm1, %v1308_v0  ;;  %v1310_v9 = vmax.f32 %v1180_v49, 0.0 }
 0x1cb   : > { %v1309_v23 = vmax.f32 %v1175_v43, 0.0  ;;  %v1952_v4 = vpop.f32.mrb[8].mxu0 }
 0x1cc   : > { %v1190_v41 = vadd.f32 %v1952_v4, %v2745_v27  ;;  %v1184_v16 = vpop.f32.mrb[9].mxu0 }
 0x1cd   : > { %v1185_v3 = vadd.f32 %v2745_v27, %v1184_v16  ;;  %2003 = vmatmul.mubr.msk.f32.vlgmr.msra.gmra.mrb[32].mxu0 %vm1350_vm1, %v1304_v19  ;;  %2011 = vmatprep.mubr.msk.f32.mxu1 %vm1350_vm1, %v1309_v23 }
 0x1ce   : > { %2012 = vmatmul.mubr.msk.f32.gmra.mrb[4].mxu1 %vm1350_vm1, %v1310_v9  ;;  %v1312_v58 = vmax.f32 %v1190_v41, 0.0 }
 0x1cf   : > { %v1311_v46 = vmax.f32 %v1185_v3, 0.0  ;;  %v2818_v3 = vld [vmem:[%s2948_s6] ss:$0 sm:$0xff] }
 0x1d1   : > { %2014 = vmatprep.mubr.msk.f32.mxu1 %vm1350_vm1, %v1311_v46 }
 0x1d2   : > { %2015 = vmatmul.mubr.msk.f32.gmra.mrb[6].mxu1 %vm1350_vm1, %v1312_v58 }
 0x1de   : > { %v1955_v34 = vpop.f32.mrb[10].mxu0 }
 0x1df   : > { %v1200_v48 = vadd.f32 %v1955_v34, %v2745_v27  ;;  %v1194_v50 = vpop.f32.mrb[11].mxu0 }
 0x1e0   : > { %v1195_v52 = vadd.f32 %v2745_v27, %v1194_v50 }
 0x1e1   : > { %v1314_v47 = vmax.f32 %v1200_v48, 0.0 }
 0x1e2   : > { %v1313_v53 = vmax.f32 %v1195_v52, 0.0 }
 0x1e4   : > { %2017 = vmatprep.mubr.msk.f32.mxu1 %vm1350_vm1, %v1313_v53 }
 0x1e5   : > { %2018 = vmatmul.mubr.msk.f32.gmra.mrb[8].mxu1 %vm1350_vm1, %v1314_v47 }
 0x1f1   : > { %v1958_v54 = vpop.f32.mrb[12].mxu0 }
 0x1f2   : > { %v1210_v62 = vadd.f32 %v1958_v54, %v2745_v27  ;;  %v1204_v22 = vpop.f32.mrb[13].mxu0 }
 0x1f3   : > { %v1205_v56 = vadd.f32 %v2745_v27, %v1204_v22 }
 0x1f4   : > { %v1316_v25 = vmax.f32 %v1210_v62, 0.0 }
 0x1f5   : > { %v1315_v59 = vmax.f32 %v1205_v56, 0.0 }
 0x1f7   : > { %2020 = vmatprep.mubr.msk.f32.mxu1 %vm1350_vm1, %v1315_v59 }
 0x1f8   : > { %2021 = vmatmul.mubr.msk.f32.gmra.mrb[10].mxu1 %vm1350_vm1, %v1316_v25 }
 0x204   : > { %v1961_v45 = vpop.f32.mrb[14].mxu0 }
 0x205   : > { %v1220_v61 = vadd.f32 %v1961_v45, %v2745_v27  ;;  %v1214_v11 = vpop.f32.mrb[15].mxu0 }
 0x206   : > { %v1215_v63 = vadd.f32 %v2745_v27, %v1214_v11 }
 0x207   : > { %v1318_v2 = vmax.f32 %v1220_v61, 0.0 }
 0x208   : > { %v1317_v5 = vmax.f32 %v1215_v63, 0.0 }
 0x20a   : > { %2023 = vmatprep.mubr.msk.f32.mxu1 %vm1350_vm1, %v1317_v5 }
 0x20b   : > { %2024 = vmatmul.mubr.msk.f32.gmra.mrb[12].mxu1 %vm1350_vm1, %v1318_v2 }
 0x217   : > { %v1964_v6 = vpop.f32.mrb[16].mxu0 }
 0x218   : > { %v1230_v20 = vadd.f32 %v1964_v6, %v2745_v27  ;;  %v1224_v17 = vpop.f32.mrb[17].mxu0 }
 0x219   : > { %v1225_v51 = vadd.f32 %v2745_v27, %v1224_v17 }
 0x21a   : > { %v1320_v14 = vmax.f32 %v1230_v20, 0.0 }
 0x21b   : > { %v1319_v10 = vmax.f32 %v1225_v51, 0.0 }
 0x21d   : > { %2026 = vmatprep.mubr.msk.f32.mxu1 %vm1350_vm1, %v1319_v10 }
 0x21e   : > { %2027 = vmatmul.mubr.msk.f32.gmra.mrb[14].mxu1 %vm1350_vm1, %v1320_v14 }
 0x22a   : > { %v1967_v12 = vpop.f32.mrb[18].mxu0 }
 0x22b   : > { %v1240_v18 = vadd.f32 %v1967_v12, %v2745_v27  ;;  %v1234_v15 = vpop.f32.mrb[19].mxu0 }
 0x22c   : > { %v1235_v57 = vadd.f32 %v2745_v27, %v1234_v15 }
 0x22d   : > { %v1322_v26 = vmax.f32 %v1240_v18, 0.0 }
 0x22e   : > { %v1321_v28 = vmax.f32 %v1235_v57, 0.0 }
 0x230   : > { %2029 = vmatprep.mubr.msk.f32.mxu1 %vm1350_vm1, %v1321_v28 }
 0x231   : > { %2030 = vmatmul.mubr.msk.f32.gmra.mrb[16].mxu1 %vm1350_vm1, %v1322_v26 }
 0x23d   : > { %v1970_v8 = vpop.f32.mrb[20].mxu0 }
 0x23e   : > { %v1250_v7 = vadd.f32 %v1970_v8, %v2745_v27  ;;  %v1244_v39 = vpop.f32.mrb[21].mxu0 }
 0x23f   : > { %v1245_v1 = vadd.f32 %v2745_v27, %v1244_v39 }
 0x240   : > { %v1324_v37 = vmax.f32 %v1250_v7, 0.0 }
 0x241   : > { %v1323_v13 = vmax.f32 %v1245_v1, 0.0 }
 0x243   : > { %2032 = vmatprep.mubr.msk.f32.mxu1 %vm1350_vm1, %v1323_v13 }
 0x244   : > { %2033 = vmatmul.mubr.msk.f32.gmra.mrb[18].mxu1 %vm1350_vm1, %v1324_v37 }
 0x250   : > { %v1973_v29 = vpop.f32.mrb[22].mxu0 }
 0x251   : > { %v1260_v30 = vadd.f32 %v1973_v29, %v2745_v27  ;;  %v1254_v31 = vpop.f32.mrb[23].mxu0 }
 0x252   : > { %v1255_v32 = vadd.f32 %v2745_v27, %v1254_v31 }
 0x253   : > { %v1326_v35 = vmax.f32 %v1260_v30, 0.0 }
 0x254   : > { %v1325_v33 = vmax.f32 %v1255_v32, 0.0 }
 0x256   : > { %2035 = vmatprep.mubr.msk.f32.mxu1 %vm1350_vm1, %v1325_v33 }
 0x257   : > { %2036 = vmatmul.mubr.msk.f32.gmra.mrb[20].mxu1 %vm1350_vm1, %v1326_v35 }
 0x263   : > { %v1976_v60 = vpop.f32.mrb[24].mxu0 }
 0x264   : > { %v1270_v44 = vadd.f32 %v1976_v60, %v2745_v27  ;;  %v1264_v21 = vpop.f32.mrb[25].mxu0 }
 0x265   : > { %v1265_v55 = vadd.f32 %v2745_v27, %v1264_v21 }
 0x266   : > { %v1328_v38 = vmax.f32 %v1270_v44, 0.0 }
 0x267   : > { %v1327_v36 = vmax.f32 %v1265_v55, 0.0 }
 0x269   : > { %2038 = vmatprep.mubr.msk.f32.mxu1 %vm1350_vm1, %v1327_v36 }
 0x26a   : > { %2039 = vmatmul.mubr.msk.f32.gmra.mrb[22].mxu1 %vm1350_vm1, %v1328_v38 }
 0x276   : > { %v1979_v24 = vpop.f32.mrb[26].mxu0 }
 0x277   : > { %v1280_v40 = vadd.f32 %v1979_v24, %v2745_v27  ;;  %v1274_v0 = vpop.f32.mrb[27].mxu0 }
 0x278   : > { %v1275_v49 = vadd.f32 %v2745_v27, %v1274_v0 }
 0x279   : > { %v1330_v43 = vmax.f32 %v1280_v40, 0.0 }
 0x27a   : > { %v1329_v42 = vmax.f32 %v1275_v49, 0.0 }
 0x27c   : > { %2041 = vmatprep.mubr.msk.f32.mxu1 %vm1350_vm1, %v1329_v42 }
 0x27d   : > { %2042 = vmatmul.mubr.msk.f32.gmra.mrb[24].mxu1 %vm1350_vm1, %v1330_v43 }
 0x289   : > { %v1982_v19 = vpop.f32.mrb[28].mxu0 }
 0x28a   : > { %v1290_v23 = vadd.f32 %v1982_v19, %v2745_v27  ;;  %v1284_v4 = vpop.f32.mrb[29].mxu0 }
 0x28b   : > { %v1285_v9 = vadd.f32 %v2745_v27, %v1284_v4 }
 0x28c   : > { %v1332_v16 = vmax.f32 %v1290_v23, 0.0 }
 0x28d   : > { %v1331_v41 = vmax.f32 %v1285_v9, 0.0 }
 0x28f   : > { %2044 = vmatprep.mubr.msk.f32.mxu1 %vm1350_vm1, %v1331_v41 }
 0x290   : > { %2045 = vmatmul.mubr.msk.f32.gmra.mrb[26].mxu1 %vm1350_vm1, %v1332_v16 }
 0x299   : > { %v2007_v46 = vpop.f32.mrb[0].mxu1 }
 0x29a   : > { %v1529_v58 = vadd.f32 %v2007_v46, %v2818_v3  ;;  %v1523_v34 = vpop.f32.mrb[1].mxu1 }
 0x29b   : > { %v1524_v48 = vadd.f32 %v2818_v3, %v1523_v34 }
 0x29c   : > { %1675 = vst [vmem:[%s2822_s20 + $0x18] sm:$0xff] %v1529_v58  ;;  %v1985_v50 = vpop.f32.mrb[30].mxu0 }
 0x29d   : > { %1674 = vst [vmem:[%s2822_s20 + $0x10] sm:$0xff] %v1524_v48  ;;  %v1300_v52 = vadd.f32 %v1985_v50, %v2745_v27  ;;  %v1294_v53 = vpop.f32.mrb[31].mxu0  ;;  %v2010_v47 = vpop.f32.mrb[2].mxu1 }
 0x29e   : > { %v1295_v54 = vadd.f32 %v2745_v27, %v1294_v53  ;;  %v1539_v62 = vadd.f32 %v2010_v47, %v2818_v3  ;;  %v1533_v22 = vpop.f32.mrb[3].mxu1 }
 0x29f   : > { %v1534_v56 = vadd.f32 %v2818_v3, %v1533_v22  ;;  %v1334_v45 = vmax.f32 %v1300_v52, 0.0 }
 0x2a0   : > { %v1333_v59 = vmax.f32 %v1295_v54, 0.0  ;;  %1677 = vst [vmem:[%s2822_s20 + $0x28] sm:$0xff] %v1539_v62  ;;  %v2004_v25 = vpop.f32.mrb[32].mxu0 }
 0x2a1   : > { %1676 = vst [vmem:[%s2822_s20 + $0x20] sm:$0xff] %v1534_v56  ;;  %v1519_v61 = vadd.f32 %v2004_v25, %v2818_v3  ;;  %v1513_v11 = vpop.f32.mrb[33].mxu0  ;;  %v2013_v63 = vpop.f32.mrb[4].mxu1 }
 0x2a2   : > { %v1514_v27 = vadd.f32 %v2818_v3, %v1513_v11  ;;  %v1549_v5 = vadd.f32 %v2013_v63, %v2818_v3  ;;  %v1543_v2 = vpop.f32.mrb[5].mxu1  ;;  %2047 = vmatprep.mubr.msk.f32.mxu1 %vm1350_vm1, %v1333_v59 }
 0x2a3   : > { %1673 = vst [vmem:[%s2822_s20 + $0x8] sm:$0xff] %v1519_v61  ;;  %v1544_v6 = vadd.f32 %v2818_v3, %v1543_v2  ;;  %2048 = vmatmul.mubr.msk.f32.gmra.mrb[28].mxu1 %vm1350_vm1, %v1334_v45 }
 0x2a4   : > { %1672 = vst [vmem:[%s2822_s20] sm:$0xff] %v1514_v27  ;;  %1679 = vst [vmem:[%s2822_s20 + $0x38] sm:$0xff] %v1549_v5 }
 0x2a5   : > { %1678 = vst [vmem:[%s2822_s20 + $0x30] sm:$0xff] %v1544_v6  ;;  %v2016_v20 = vpop.f32.mrb[6].mxu1 }
 0x2a6   : > { %v1559_v17 = vadd.f32 %v2016_v20, %v2818_v3  ;;  %v1553_v51 = vpop.f32.mrb[7].mxu1 }
 0x2a7   : > { %v1554_v10 = vadd.f32 %v2818_v3, %v1553_v51 }
 0x2a8   : > { %1681 = vst [vmem:[%s2822_s20 + $0x48] sm:$0xff] %v1559_v17 }
 0x2a9   : > { %1680 = vst [vmem:[%s2822_s20 + $0x40] sm:$0xff] %v1554_v10 }
 0x2b8   : > { %v2019_v14 = vpop.f32.mrb[8].mxu1 }
 0x2b9   : > { %v1569_v12 = vadd.f32 %v2019_v14, %v2818_v3  ;;  %v1563_v18 = vpop.f32.mrb[9].mxu1 }
 0x2ba   : > { %v1564_v15 = vadd.f32 %v2818_v3, %v1563_v18 }
 0x2bb   : > { %1683 = vst [vmem:[%s2822_s20 + $0x58] sm:$0xff] %v1569_v12 }
 0x2bc   : > { %1682 = vst [vmem:[%s2822_s20 + $0x50] sm:$0xff] %v1564_v15 }
 0x2cb   : > { %v2022_v57 = vpop.f32.mrb[10].mxu1 }
 0x2cc   : > { %v1579_v28 = vadd.f32 %v2022_v57, %v2818_v3  ;;  %v1573_v26 = vpop.f32.mrb[11].mxu1 }
 0x2cd   : > { %v1574_v8 = vadd.f32 %v2818_v3, %v1573_v26 }
 0x2ce   : > { %1685 = vst [vmem:[%s2822_s20 + $0x68] sm:$0xff] %v1579_v28 }
 0x2cf   : > { %1684 = vst [vmem:[%s2822_s20 + $0x60] sm:$0xff] %v1574_v8 }
 0x2de   : > { %v2025_v7 = vpop.f32.mrb[12].mxu1 }
 0x2df   : > { %v1589_v39 = vadd.f32 %v2025_v7, %v2818_v3  ;;  %v1583_v1 = vpop.f32.mrb[13].mxu1 }
 0x2e0   : > { %v1584_v13 = vadd.f32 %v2818_v3, %v1583_v1 }
 0x2e1   : > { %1687 = vst [vmem:[%s2822_s20 + $0x78] sm:$0xff] %v1589_v39 }
 0x2e2   : > { %1686 = vst [vmem:[%s2822_s20 + $0x70] sm:$0xff] %v1584_v13 }
 0x2f1   : > { %v2028_v37 = vpop.f32.mrb[14].mxu1 }
 0x2f2   : > { %v1599_v29 = vadd.f32 %v2028_v37, %v2818_v3  ;;  %v1593_v30 = vpop.f32.mrb[15].mxu1 }
 0x2f3   : > { %v1594_v31 = vadd.f32 %v2818_v3, %v1593_v30 }
 0x2f4   : > { %1689 = vst [vmem:[%s2822_s20 + $0x88] sm:$0xff] %v1599_v29 }
 0x2f5   : > { %1688 = vst [vmem:[%s2822_s20 + $0x80] sm:$0xff] %v1594_v31 }
 0x304   : > { %v2031_v32 = vpop.f32.mrb[16].mxu1 }
 0x305   : > { %v1609_v33 = vadd.f32 %v2031_v32, %v2818_v3  ;;  %v1603_v35 = vpop.f32.mrb[17].mxu1 }
 0x306   : > { %v1604_v60 = vadd.f32 %v2818_v3, %v1603_v35 }
 0x307   : > { %1691 = vst [vmem:[%s2822_s20 + $0x98] sm:$0xff] %v1609_v33 }
 0x308   : > { %1690 = vst [vmem:[%s2822_s20 + $0x90] sm:$0xff] %v1604_v60 }
 0x317   : > { %v2034_v44 = vpop.f32.mrb[18].mxu1 }
 0x318   : > { %v1619_v21 = vadd.f32 %v2034_v44, %v2818_v3  ;;  %v1613_v55 = vpop.f32.mrb[19].mxu1 }
 0x319   : > { %v1614_v36 = vadd.f32 %v2818_v3, %v1613_v55 }
 0x31a   : > { %1693 = vst [vmem:[%s2822_s20 + $0xa8] sm:$0xff] %v1619_v21 }
 0x31b   : > { %1692 = vst [vmem:[%s2822_s20 + $0xa0] sm:$0xff] %v1614_v36 }
 0x32a   : > { %v2037_v38 = vpop.f32.mrb[20].mxu1 }
 0x32b   : > { %v1629_v24 = vadd.f32 %v2037_v38, %v2818_v3  ;;  %v1623_v40 = vpop.f32.mrb[21].mxu1 }
 0x32c   : > { %v1624_v0 = vadd.f32 %v2818_v3, %v1623_v40 }
 0x32d   : > { %1695 = vst [vmem:[%s2822_s20 + $0xb8] sm:$0xff] %v1629_v24 }
 0x32e   : > { %1694 = vst [vmem:[%s2822_s20 + $0xb0] sm:$0xff] %v1624_v0 }
 0x33d   : > { %v2040_v49 = vpop.f32.mrb[22].mxu1 }
 0x33e   : > { %v1639_v42 = vadd.f32 %v2040_v49, %v2818_v3  ;;  %v1633_v43 = vpop.f32.mrb[23].mxu1 }
 0x33f   : > { %v1634_v19 = vadd.f32 %v2818_v3, %v1633_v43 }
 0x340   : > { %1697 = vst [vmem:[%s2822_s20 + $0xc8] sm:$0xff] %v1639_v42 }
 0x341   : > { %1696 = vst [vmem:[%s2822_s20 + $0xc0] sm:$0xff] %v1634_v19 }
 0x350   : > { %v2043_v23 = vpop.f32.mrb[24].mxu1 }
 0x351   : > { %v1649_v4 = vadd.f32 %v2043_v23, %v2818_v3  ;;  %v1643_v9 = vpop.f32.mrb[25].mxu1 }
 0x352   : > { %v1644_v41 = vadd.f32 %v2818_v3, %v1643_v9 }
 0x353   : > { %1699 = vst [vmem:[%s2822_s20 + $0xd8] sm:$0xff] %v1649_v4 }
 0x354   : > { %1698 = vst [vmem:[%s2822_s20 + $0xd0] sm:$0xff] %v1644_v41 }
 0x363   : > { %v2046_v16 = vpop.f32.mrb[26].mxu1 }
 0x364   : > { %v1659_v46 = vadd.f32 %v2046_v16, %v2818_v3  ;;  %v1653_v58 = vpop.f32.mrb[27].mxu1 }
 0x365   : > { %v1654_v34 = vadd.f32 %v2818_v3, %v1653_v58 }
 0x366   : > { %1701 = vst [vmem:[%s2822_s20 + $0xe8] sm:$0xff] %v1659_v46 }
 0x367   : > { %1700 = vst [vmem:[%s2822_s20 + $0xe0] sm:$0xff] %v1654_v34 }
 0x376   : > { %v2049_v48 = vpop.f32.mrb[28].mxu1 }
 0x377   : > { %v1669_v50 = vadd.f32 %v2049_v48, %v2818_v3  ;;  %v1663_v52 = vpop.f32.mrb[29].mxu1 }
 0x378   : > { %v1664_v53 = vadd.f32 %v2818_v3, %v1663_v52 }
 0x379   : > { %1703 = vst [vmem:[%s2822_s20 + $0xf8] sm:$0xff] %v1669_v50 }
 0x37a   : > { %1702 = vst [vmem:[%s2822_s20 + $0xf0] sm:$0xff] %v1664_v53 }
 0x37b   : > { %2187 = shalt.err (!%p2184_p3)
}
 0x37c   : > { %s2188_s16 = scalar_lea.hbm %s2892_s8, 4096  ;;  %s2192_s19 = scalar_lea.hbm %s2949_s7, 8192 }
 0x37d   : > { %p2189_p4 = scmp.ne.s32.totalorder %s2892_s8, %s2188_s16  ;;  %p2193_p9 = scmp.lt.u32.totalorder %s2892_s8, %s2949_s7 }
 0x37e   : > { %p2194_p10 = scmp.lt.u32.totalorder %s2192_s19, %s2188_s16  ;;  %p2196_p12 = scmp.lt.u32.totalorder %s2188_s16, %s2892_s8 }
 0x37f   : > { %p2190_p7 = pnand %p2189_p4, %p2322_p5 }
 0x380   : > { %p2195_p11 = por %p2194_p10, %p2193_p9 }
 0x381   : > { %p2191_p8 = pneg %p2190_p7 }
 0x382   : > { %p2197_p13 = por %p2196_p12, %p2195_p11 }
 0x384   : > { %p2198_p0 = pnand %p2197_p13, %p2191_p8 }
 0x386   : > { %2201 = shalt.err (!%p2198_p0)
}
 0x387   : > { %s2242_s23 = smov 128   ;;  %s2243_s29 = smov 8  }
 0x388   : > { %2078 = dma.vmem_to_hbm [thread:$0]  (%p2322_p5), %s2894_s22, 4096, %s2892_s8, %s2901_s28, %s2242_s23, %s2242_s23, %s2243_s29  }
 0x389 PF: > { %p2084_p1 = scmp.ge.s32.totalorder %s2236_s27, 2  ;;  %s1733_s9 = sand.u32 1, %s2224_s24  }
 0x38a   : > { %s1734_s13 = scalar_lea.sflag [#allocation3], %s1733_s9 }
 0x38b   : > { %p2081_p2 = pnand %p2084_p1, %p2326_p6 }
 0x38d   : > { %2219 = dma.done.wait (!%p2081_p2), %s1734_s13, 4096  }
 0x38e   : > { %2221 = vsyncadd (!%p2081_p2), %s1734_s13, 4294963200  ;;  %p17_p3 = scmp.ge.s32.totalorder %s2309_s30, 4   ;;  %s2952_s24 = smov %s2228_s25 }
 0x38f   : > { %s2953_s25 = smov %s2232_s26  ;;  %s2954_s26 = smov %s2320_s10 }
 0x390   : > { %s2955_s27 = smov %s2309_s30  ;;  %19 = sbr.rel (!%p17_p3) target bundleno = 3 (0x3), region = 83 }
 0x397   :  { %1739 = vsyncpa [#allocation3], 1 }
 0x398   :  { %1741 = vsyncpa [#allocation3 + $0x1], 1 }

</bundles_post_ra>
